<compile_context>
chip_gen: v5e
topology: v5e:2x2
jax: 0.10.0
libtpu: 0.0.40
codegen_flags: <defaults>
</compile_context>

<pallas_src>
import functools
import math

import numpy as np
import jax
import jax.numpy as jnp
from jax.experimental import pallas as pl
from jax.experimental.pallas import tpu as pltpu


# ---------------------------------------------------------------------------
# Positional-encoding table (precomputed once, cached)
# ---------------------------------------------------------------------------

@functools.lru_cache(maxsize=8)
def positional_encoding_table(max_seq_len: int, d_model: int) -> np.ndarray:
    """Vectorized, exact replica of the PyTorch PositionalEncoder.__init__ loop.

        pe[pos, i]   = sin(pos / 10000 ** (2 * i       / d_model))
        pe[pos, i+1] = cos(pos / 10000 ** (2 * (i + 1) / d_model))
    """
    assert d_model % 2 == 0, "PositionalEncoder requires an even d_model"
    pos = np.arange(max_seq_len, dtype=np.float64)[:, None]        # (S, 1)
    i = np.arange(0, d_model, 2, dtype=np.float64)[None, :]        # (1, D/2)
    pe = np.zeros((max_seq_len, d_model), dtype=np.float32)
    pe[:, 0::2] = np.sin(pos / np.power(10000.0, (2.0 * i) / d_model))
    pe[:, 1::2] = np.cos(pos / np.power(10000.0, (2.0 * (i + 1.0)) / d_model))
    return pe


# ---------------------------------------------------------------------------
# Pallas kernel
# ---------------------------------------------------------------------------

def _pos_encode_kernel(x_ref, pe_ref, o_ref, *, scale):
    # o = x * sqrt(d_model) + pe  (dropout == identity in eval mode).
    # Compute in f32, cast explicitly to the output dtype (bf16-safe).
    x = x_ref[...].astype(jnp.float32)
    pe = pe_ref[...].astype(jnp.float32)
    o_ref[...] = (x * scale + pe).astype(o_ref.dtype)


def _pick_seq_tile(seq_len: int, d_model: int, itemsize: int,
                   target_block_bytes: int = 2 << 20) -> int:
    """Byte-budget-aware seq tile.

    Targets ~2 MiB blocks (measured ~85% of HBM roofline for streaming ops);
    with 3 double-buffered arrays that is ~12 MiB of pipeline VMEM, which fits
    the default scoped VMEM limit on v5e (16 MiB) and v6e/v7x (32 MiB).
    """
    row_bytes = d_model * itemsize
    budget_rows = max(8, target_block_bytes // row_bytes)
    if seq_len <= budget_rows:
        return seq_len          # single seq tile (full-dim block is always legal)
    # Largest sublane-aligned (multiple of 8) divisor of seq_len under budget.
    ts = (budget_rows // 8) * 8
    while ts >= 8:
        if seq_len % ts == 0:
            return ts
        ts -= 8
    # TODO(synk): no aligned divisor (odd/prime seq_len) -> one big tile; pad
    #             or use a masked last block if such shapes show up for real.
    return seq_len


def pallas_positional_encoder(x, pe_full, d_model):
    """x: (B, S, D) activations; pe_full: (max_seq_len, D) table in x.dtype."""
    B, S, D = x.shape
    assert pe_full.shape[0] >= S and pe_full.shape[1] == D
    ts = _pick_seq_tile(S, D, x.dtype.itemsize)
    # Seq tiles outer (parallel -> v7x TC sharding); batch innermost and
    # "arbitrary" so the PE block index is unchanged across consecutive steps
    # and its DMA is skipped (PE streamed once per seq tile, reused over B).
    grid = (S // ts, B)
    kern = functools.partial(_pos_encode_kernel, scale=float(math.sqrt(d_model)))
    return pl.pallas_call(
        kern,
        grid=grid,
        in_specs=[
            # batch dim squeezed -> kernel sees a 2-D (ts, D) ref
            pl.BlockSpec((None, ts, D), lambda s, b: (b, s, 0)),
            # full PE buffer; index_map only reaches rows < S
            pl.BlockSpec((ts, D), lambda s, b: (s, 0)),
        ],
        out_specs=pl.BlockSpec((None, ts, D), lambda s, b: (b, s, 0)),
        out_shape=jax.ShapeDtypeStruct((B, S, D), x.dtype),
        compiler_params=pltpu.CompilerParams(
            dimension_semantics=("parallel", "arbitrary"),
            vmem_limit_bytes=32 << 20),
    )(x, pe_full)


# ---------------------------------------------------------------------------
# Module-style wrapper mirroring the PyTorch class
# ---------------------------------------------------------------------------

class PositionalEncoder:
    def __init__(self, d_model, max_seq_len=6000, dropout=0.1):
        self.d_model = d_model
        self.dropout = dropout   # TODO(synk): unused — identity (eval-mode) forward.
        # Buffer precomputed once at construction (like register_buffer).
        self.pe = jnp.asarray(positional_encoding_table(max_seq_len, d_model))
        self._pe_by_dtype = {}   # one-time casts so bf16 runs stay bf16 end-to-end

    def _pe_for(self, dtype):
        key = jnp.dtype(dtype).name
        if key not in self._pe_by_dtype:
            self._pe_by_dtype[key] = self.pe.astype(dtype)
        return self._pe_by_dtype[key]

    def __call__(self, x):
        # Full pe buffer is passed; the kernel grid bounds the rows touched
        # (no per-call device-side [:seq_len] slice).
        return pallas_positional_encoder(x, self._pe_for(x.dtype), self.d_model)


# ---------------------------------------------------------------------------
# Main
# ---------------------------------------------------------------------------

if __name__ == "__main__":
    B, S, D = 2, 128, 128   # batch, seq, d_model (lane-dense last dim)

    key = jax.random.PRNGKey(0)
    x = jax.random.normal(key, (B, S, D), jnp.float32)

    encoder = PositionalEncoder(d_model=D, max_seq_len=6000)

    # f32 path
    out = jax.block_until_ready(encoder(x))
    ref = jax.block_until_ready(x * math.sqrt(D) + encoder.pe[:S][None])
    np.testing.assert_allclose(np.asarray(out), np.asarray(ref),
                               rtol=1e-6, atol=1e-6)
    assert out.shape == (B, S, D)

    # bf16 path (halves HBM traffic of this mem-bound kernel)
    x_bf16 = x.astype(jnp.bfloat16)
    out_bf16 = jax.block_until_ready(encoder(x_bf16))
    ref_bf16 = (x_bf16.astype(jnp.float32) * math.sqrt(D)
                + encoder.pe[:S][None]).astype(jnp.bfloat16)
    np.testing.assert_allclose(np.asarray(out_bf16, dtype=np.float32),
                               np.asarray(ref_bf16, dtype=np.float32),
                               rtol=2e-2, atol=2e-2)
    assert out_bf16.dtype == jnp.bfloat16

    print("KERNEL_OK")
</pallas_src>

<mosaic_0001>
module attributes {stable_mosaic.version = 11 : i64} {
  func.func @_pos_encode_kernel(%arg0: i32, %arg1: i32, %arg2: memref<1x128x128xf32, #tpu.memory_space<vmem>>, %arg3: memref<128x128xf32, #tpu.memory_space<vmem>>, %arg4: memref<1x128x128xf32, #tpu.memory_space<vmem>>) attributes {dimension_semantics = [#tpu.dimension_semantics<parallel>, #tpu.dimension_semantics<arbitrary>], iteration_bounds = array<i64: 1, 2>, scalar_prefetch = 0 : i64, scratch_operands = 0 : i64, tpu.core_type = #tpu.core_type<tc>, window_params = [{transform_indices = @transform_0, window_bounds = array<i64: 1, 128, 128>}, {transform_indices = @transform_1, window_bounds = array<i64: 128, 128>}, {transform_indices = @transform_2, window_bounds = array<i64: 1, 128, 128>}]} {
    %c0 = arith.constant 0 : index
    %c0_0 = arith.constant 0 : index
    %c0_1 = arith.constant 0 : index
    %0 = vector.load %arg2[%c0, %c0_0, %c0_1] : memref<1x128x128xf32, #tpu.memory_space<vmem>>, vector<1x128x128xf32>
    %1 = vector.shape_cast %0 : vector<1x128x128xf32> to vector<128x128xf32>
    %c0_2 = arith.constant 0 : index
    %c0_3 = arith.constant 0 : index
    %2 = vector.load %arg3[%c0_2, %c0_3] : memref<128x128xf32, #tpu.memory_space<vmem>>, vector<128x128xf32>
    %cst = arith.constant 11.3137083 : f32
    %3 = vector.broadcast %cst : f32 to vector<128x128xf32>
    %4 = arith.mulf %1, %3 : vector<128x128xf32>
    %5 = arith.addf %4, %2 : vector<128x128xf32>
    %c0_4 = arith.constant 0 : index
    %c0_5 = arith.constant 0 : index
    %c0_6 = arith.constant 0 : index
    %6 = vector.load %arg4[%c0_4, %c0_5, %c0_6] : memref<1x128x128xf32, #tpu.memory_space<vmem>>, vector<1x128x128xf32>
    %7 = vector.shape_cast %6 : vector<1x128x128xf32> to vector<128x128xf32>
    %8 = vector.shape_cast %5 : vector<128x128xf32> to vector<1x128x128xf32>
    tpu.vector_store %arg4[%c0_4, %c0_5, %c0_6], %8 {strides = array<i32>} : memref<1x128x128xf32, #tpu.memory_space<vmem>>, vector<1x128x128xf32>,
    return
  }
  func.func @transform_0(%arg0: i32, %arg1: i32) -> (i32, i32, i32) {
    %c0_i32 = arith.constant 0 : i32
    %c0_i32_0 = arith.constant 0 : i32
    return %arg1, %arg0, %c0_i32 : i32, i32, i32
  }
  func.func @transform_1(%arg0: i32, %arg1: i32) -> (i32, i32) {
    %c0_i32 = arith.constant 0 : i32
    %c0_i32_0 = arith.constant 0 : i32
    return %arg0, %c0_i32 : i32, i32
  }
  func.func @transform_2(%arg0: i32, %arg1: i32) -> (i32, i32, i32) {
    %c0_i32 = arith.constant 0 : i32
    %c0_i32_0 = arith.constant 0 : i32
    return %arg1, %arg0, %c0_i32 : i32, i32, i32
  }
}

</mosaic_0001>

<bundles_post_ra>
// kernel: tpu_custom_call.1
= control target key start
LH: loop header
LB: loop body
LE: loop exit
PB: predicated region body
PF: predicated region fallthrough
CT: control target
= control target key end

     0   :  { %7 = vsyncpa [#allocation3], 0  ;;  %s874_s0 = inlined_call_operand.hbm [shape: f32[2,128,128], index: 0, kind: input, shape index: {}]   ;;  %s875_s1 = inlined_call_operand.hbm [shape: f32[6000,128], index: 1, kind: input, shape index: {}]   ;;  %s876_s2 = inlined_call_operand.hbm [shape: f32[2,128,128], index: 2, kind: output, shape index: {}]  }
   0x1   :  { %9 = vsyncpa [#allocation3 + $0x1], 0 }
   0x2   :  { %10 = vsyncpa [#allocation6], 0 }
   0x3   :  { %11 = vsyncpa [#allocation4], 0 }
   0x4   :  { %13 = vsyncpa [#allocation4 + $0x1], 0  ;;  %s682_s9 = smov 0   ;;  %s684_s10 = smov 0  }
   0x5   :  { %s686_s11 = smov 0   ;;  %s688_s12 = smov 0  }
   0x6   :  { %s690_s13 = smov 0   ;;  %s692_s14 = smov 0  }
   0x7 LB: > { %s418_s15 = sadd.s32 4294967295, %s660_s14   ;;  %s419_s16 = sadd.s32 4294967294, %s660_s14   ;;  %s660_s14 = sphi %s692_s14, %s19_s14   ;;  %s656_s13 = sphi %s690_s13, %s888_s13   ;;  %s652_s12 = sphi %s688_s12, %s887_s12   ;;  %s648_s11 = sphi %s686_s11, %s886_s11   ;;  %s644_s10 = sphi %s684_s10, %s885_s10   ;;  %s640_s9 = sphi %s682_s9, %s884_s9  }
   0x8   : > { %p53_p0 = scmp.ne.s32.totalorder %s644_s10, %s640_s9  ;;  %p716_p1 = scmp.eq.s32.totalorder %s418_s15, 0 }
   0x9   : > { %p720_p2 = scmp.eq.s32.totalorder %s418_s15, 1  ;;  %p111_p3 = scmp.eq.s32.totalorder %s419_s16, 1 }
   0xa   : > { %p726_p4 = por %p716_p1, %p53_p0  ;;  %p420_p5 = scmp.ge.s32.totalorder %s660_s14, 1 }
   0xb   : > { %p731_p6 = por %p111_p3, %p53_p0  ;;  %p118_p7 = scmp.lt.s32.totalorder %s660_s14, 3 }
   0xc   : > { %s139_s23 = sshll.u32 %s875_s1, 4  ;;  %s662_s25 = smov [#allocation5]   ;;  %s140_s23 = int_to_ptr.hbm [resolvable:$true] %s139_s23 }
   0xd   : > { %p739_p8 = pnand %p420_p5, %p118_p7  ;;  %s141_s26 = sshll.u32 %s662_s25, 4  ;;  %s142_s26 = int_to_ptr.vmem [resolvable:$true] %s141_s26 }
   0xe   : > { %p422_p11 = scmp.ge.s32.totalorder %s660_s14, 2  ;;  %s663_s27 = smov 128  }
   0xf   : > { %p445_p9 = pneg %p739_p8  ;;  %s664_s28 = smov 8  }
  0x10   : > { %s28_s29 = sadd.s32 1, %s656_s13  ;;  %s40_s30 = sadd.s32 1, %s648_s11 }
  0x11   : > { %p446_p10 = pnand %p445_p9, %p716_p1  ;;  %p29_p12 = scmp.ge.s32.totalorder %s28_s29, 2 }
  0x12   : > { %p47_p13 = scmp.ne.s32.totalorder %s648_s11, %s644_s10  ;;  %p48_p0 = scmp.eq.s32.totalorder %s660_s14, 0 }
  0x13   : > { %448 = dma.hbm_to_vmem [thread:$0]  (!%p446_p10), %s140_s23, 2048, %s142_s26, [#allocation6], %s663_s27, %s663_s27, %s664_s28  }
  0x14   : > { %s890_s29 = smov (%p29_p12, %s28_s29), 0  ;;  %p758_p3 = por %p48_p0, %p47_p13 }
  0x15   : > { %p764_p5 = por %p720_p2, %p47_p13  ;;  %s35_s5 = ssub.s32 %s656_s13, %s890_s29 }
  0x16   : > { %p458_p7 = scmp.lt.s32.totalorder %s660_s14, 2  ;;  %p38_p9 = scmp.eq.s32.totalorder %s35_s5, 0 }
  0x17   : > { %s155_s6 = sand.u32 1, %s648_s11   ;;  %s435_s15 = sshll.u32 %s656_s13, 7 }
  0x18   : > { %s423_s7 = sshll.u32 %s155_s6, 7  ;;  %s166_s22 = scalar_lea.hbm %s874_s0, %s435_s15 }
  0x19   : > { %s773_s8 = scalar_select %p38_p9, %s648_s11, %s40_s30  }
  0x1a   : > { %s159_s23 = scalar_lea.vmem [#allocation2], %s423_s7  ;;  %s167_s18 = sshll.u32 %s166_s22, 4  ;;  %s168_s18 = int_to_ptr.hbm [resolvable:$true] %s167_s18 }
  0x1b   : > { %s169_s25 = sshll.u32 %s159_s23, 4  ;;  %p450_p2 = pnand %p458_p7, %p758_p3  ;;  %s170_s25 = int_to_ptr.vmem [resolvable:$true] %s169_s25 }
  0x1c   : > { %s156_s26 = scalar_lea.sflag [#allocation3], %s155_s6  ;;  %181 = sbr.rel (%p739_p8) target bundleno = 60 (0x3c), region = 28 }
  0x1d   : > { %452 = dma.hbm_to_vmem [thread:$0]  (!%p450_p2), %s168_s18, 2048, %s170_s25, %s156_s26, %s663_s27, %s663_s27, %s664_s28  }
  0x1e   : > { %s787_s30 = sand.u32 (!%p739_p8), 1, %s644_s10  }
  0x1f   : > { %s427_s5 = sshll.u32 (!%p739_p8), %s787_s30, 7  ;;  %s184_s7 = scalar_lea.sflag (!%p739_p8), [#allocation3], %s787_s30 }
  0x20   : > { %s791_s15 = scalar_lea.vmem (!%p739_p8), [#allocation2], %s427_s5 }
  0x21   : > { %627 = dma.done.wait (%p726_p4), %s184_s7, 2048  }
  0x22   : > { %629 = vsyncadd (%p726_p4), %s184_s7, 4294965248 }
  0x23   : > { %631 = dma.done.wait (%p716_p1), [#allocation6], 2048  }
  0x24   : > { %633 = vsyncadd (%p716_p1), [#allocation6], 4294965248  ;;  %v221_v0 = vld [vmem:[%s791_s15] sm:$0xff]  ;;  %v222_v2 = vld [vmem:[%s791_s15 + $0x8] sm:$0xff]  ;;  %s808_s17 = scalar_lea.vmem [#allocation7], %s427_s5  ;;  %s436_s19 = sshll.u32 %s652_s12, 7 }
  0x25   : > { %v237_v1 = vld [vmem:[#allocation5] sm:$0xff]  ;;  %v253_v3 = vmul.f32 11.313708, %v221_v0  ;;  %v238_v4 = vld [vmem:[#allocation5 + $0x8] sm:$0xff]  ;;  %v254_v5 = vmul.f32 11.313708, %v222_v2  ;;  %s315_s27 = scalar_lea.hbm %s876_s2, %s436_s19 }
  0x26   : > { %v223_v6 = vld [vmem:[%s791_s15 + $0x10] sm:$0xff]  ;;  %v224_v9 = vld [vmem:[%s791_s15 + $0x18] sm:$0xff]  ;;  %v225_v14 = vld [vmem:[%s791_s15 + $0x20] sm:$0xff]  ;;  %s316_s28 = sshll.u32 %s808_s17, 4  ;;  %s318_s3 = sshll.u32 %s315_s27, 4  ;;  %s317_s28 = int_to_ptr.vmem [resolvable:$true] %s316_s28  ;;  %s319_s3 = int_to_ptr.hbm [resolvable:$true] %s318_s3 }
  0x27   : > { %v239_v7 = vld [vmem:[#allocation5 + $0x10] sm:$0xff]  ;;  %v255_v8 = vmul.f32 11.313708, %v223_v6  ;;  %v240_v10 = vld [vmem:[#allocation5 + $0x18] sm:$0xff]  ;;  %v269_v11 = vadd.f32 %v253_v3, %v237_v1  ;;  %v270_v12 = vadd.f32 %v254_v5, %v238_v4  ;;  %v256_v13 = vmul.f32 11.313708, %v224_v9 }
  0x28   : > { %v241_v15 = vld [vmem:[#allocation5 + $0x20] sm:$0xff]  ;;  %v226_v16 = vld [vmem:[%s791_s15 + $0x28] sm:$0xff]  ;;  %v257_v18 = vmul.f32 11.313708, %v225_v14  ;;  %v227_v21 = vld [vmem:[%s791_s15 + $0x30] sm:$0xff]  ;;  %s302_s6 = scalar_lea.sflag [#allocation4], %s787_s30 }
  0x29   : > { %v271_v17 = vadd.f32 %v255_v8, %v239_v7  ;;  %v242_v19 = vld [vmem:[#allocation5 + $0x28] sm:$0xff]  ;;  %v258_v20 = vmul.f32 11.313708, %v226_v16  ;;  %285 = vst [vmem:[%s808_s17] sm:$0xff] %v269_v11  ;;  %v272_v22 = vadd.f32 %v256_v13, %v240_v10  ;;  %v243_v23 = vld [vmem:[#allocation5 + $0x30] sm:$0xff]  ;;  %v259_v24 = vmul.f32 11.313708, %v227_v21 }
  0x2a   : > { %v228_v25 = vld [vmem:[%s791_s15 + $0x38] sm:$0xff]  ;;  %286 = vst [vmem:[%s808_s17 + $0x8] sm:$0xff] %v270_v12  ;;  %v273_v27 = vadd.f32 %v257_v18, %v241_v15  ;;  %v229_v30 = vld [vmem:[%s791_s15 + $0x40] sm:$0xff]  ;;  %v230_v32 = vld [vmem:[%s791_s15 + $0x48] sm:$0xff]  ;;  %s588_s16 = sshra.s32 %s319_s3, 4  ;;  %s594_s25 = scalar_lea.hbm %s876_s2, 256  ;;  %s589_s16 = int_to_ptr.hbm [resolvable:$true] %s588_s16 }
  0x2b   : > { %v244_v26 = vld [vmem:[#allocation5 + $0x38] sm:$0xff]  ;;  %v274_v28 = vadd.f32 %v258_v20, %v242_v19  ;;  %v260_v29 = vmul.f32 11.313708, %v228_v25  ;;  %v245_v31 = vld [vmem:[#allocation5 + $0x40] sm:$0xff]  ;;  %287 = vst [vmem:[%s808_s17 + $0x10] sm:$0xff] %v271_v17  ;;  %v275_v33 = vadd.f32 %v259_v24, %v243_v23  ;;  %v246_v35 = vld [vmem:[#allocation5 + $0x48] sm:$0xff]  ;;  %p595_p10 = scmp.lt.s32.totalorder %s589_s16, %s876_s2 }
  0x2c   : > { %v261_v34 = vmul.f32 11.313708, %v229_v30  ;;  %v262_v36 = vmul.f32 11.313708, %v230_v32  ;;  %288 = vst [vmem:[%s808_s17 + $0x18] sm:$0xff] %v272_v22  ;;  %v231_v38 = vld [vmem:[%s791_s15 + $0x50] sm:$0xff] }
  0x2d   : > { %v276_v37 = vadd.f32 %v260_v29, %v244_v26  ;;  %v247_v39 = vld [vmem:[#allocation5 + $0x50] sm:$0xff]  ;;  %v232_v40 = vld [vmem:[%s791_s15 + $0x58] sm:$0xff]  ;;  %289 = vst [vmem:[%s808_s17 + $0x20] sm:$0xff] %v273_v27  ;;  %v263_v42 = vmul.f32 11.313708, %v231_v38  ;;  %v233_v46 = vld [vmem:[%s791_s15 + $0x60] sm:$0xff] }
  0x2e   : > { %v277_v41 = vadd.f32 %v261_v34, %v245_v31  ;;  %v248_v43 = vld [vmem:[#allocation5 + $0x58] sm:$0xff]  ;;  %v264_v44 = vmul.f32 11.313708, %v232_v40  ;;  %290 = vst [vmem:[%s808_s17 + $0x28] sm:$0xff] %v274_v28  ;;  %v278_v45 = vadd.f32 %v262_v36, %v246_v35  ;;  %v249_v47 = vld [vmem:[#allocation5 + $0x60] sm:$0xff]  ;;  %v234_v48 = vld [vmem:[%s791_s15 + $0x68] sm:$0xff] }
  0x2f   : > { %291 = vst [vmem:[%s808_s17 + $0x30] sm:$0xff] %v275_v33  ;;  %v279_v49 = vadd.f32 %v263_v42, %v247_v39  ;;  %v265_v50 = vmul.f32 11.313708, %v233_v46  ;;  %v250_v51 = vld [vmem:[#allocation5 + $0x68] sm:$0xff]  ;;  %v266_v52 = vmul.f32 11.313708, %v234_v48 }
  0x30   : > { %292 = vst [vmem:[%s808_s17 + $0x38] sm:$0xff] %v276_v37  ;;  %v280_v53 = vadd.f32 %v264_v44, %v248_v43  ;;  %v235_v54 = vld [vmem:[%s791_s15 + $0x70] sm:$0xff]  ;;  %v236_v56 = vld [vmem:[%s791_s15 + $0x78] sm:$0xff]  ;;  %s590_s21 = scalar_lea.hbm %s589_s16, 128 }
  0x31   : > { %v251_v55 = vld [vmem:[#allocation5 + $0x70] sm:$0xff]  ;;  %293 = vst [vmem:[%s808_s17 + $0x40] sm:$0xff] %v277_v41  ;;  %v281_v57 = vadd.f32 %v265_v50, %v249_v47  ;;  %v267_v58 = vmul.f32 11.313708, %v235_v54  ;;  %v252_v59 = vld [vmem:[#allocation5 + $0x78] sm:$0xff]  ;;  %v282_v61 = vadd.f32 %v266_v52, %v250_v51  ;;  %p591_p1 = scmp.ne.s32.totalorder %s589_s16, %s590_s21  ;;  %p596_p12 = scmp.lt.s32.totalorder %s594_s25, %s590_s21 }
  0x32   : > { %v268_v60 = vmul.f32 11.313708, %v236_v56  ;;  %294 = vst [vmem:[%s808_s17 + $0x48] sm:$0xff] %v278_v45 }
  0x33   : > { %295 = vst [vmem:[%s808_s17 + $0x50] sm:$0xff] %v279_v49  ;;  %v283_v62 = vadd.f32 %v267_v58, %v251_v55  ;;  %p592_p4 = pnand %p591_p1, %p764_p5  ;;  %p597_p13 = por %p596_p12, %p595_p10 }
  0x34   : > { %296 = vst [vmem:[%s808_s17 + $0x58] sm:$0xff] %v280_v53  ;;  %v284_v63 = vadd.f32 %v268_v60, %v252_v59 }
  0x35   : > { %297 = vst [vmem:[%s808_s17 + $0x60] sm:$0xff] %v281_v57  ;;  %p593_p8 = pneg %p592_p4 }
  0x36   : > { %298 = vst [vmem:[%s808_s17 + $0x68] sm:$0xff] %v282_v61 }
  0x37   : > { %299 = vst [vmem:[%s808_s17 + $0x70] sm:$0xff] %v283_v62  ;;  %p598_p0 = pnand %p597_p13, %p593_p8 }
  0x38   : > { %300 = vst [vmem:[%s808_s17 + $0x78] sm:$0xff] %v284_v63 }
  0x39   : > { %601 = shalt.err (!%p598_p0)
}
  0x3a   : > { %s665_s30 = smov 128   ;;  %s666_s5 = smov 8  }
  0x3b   : > { %443 = dma.vmem_to_hbm [thread:$0]  (%p764_p5), %s317_s28, 2048, %s319_s3, %s302_s6, %s665_s30, %s665_s30, %s666_s5  }
  0x3c PF: > { %s333_s7 = sand.u32 1, %s640_s9   ;;  %p454_p3 = pnand %p422_p11, %p731_p6 }
  0x3d   : > { %s334_s15 = scalar_lea.sflag [#allocation4], %s333_s7 }
  0x3e   : > { %p455_p7 = pneg %p454_p3 }
  0x40   : > { %635 = dma.done.wait (%p455_p7), %s334_s15, 2048  }
  0x41   : > { %637 = vsyncadd (%p455_p7), %s334_s15, 4294965248  ;;  %s19_s14 = sadd.s32 1, %s660_s14   ;;  %s884_s9 = smov %s644_s10 }
  0x42   : > { %p16_p9 = scmp.ge.s32.totalorder %s19_s14, 4   ;;  %s885_s10 = smov %s648_s11 }
  0x43   : > { %s886_s11 = smov %s773_s8  ;;  %s887_s12 = smov %s656_s13 }
  0x44   : > { %s888_s13 = smov %s890_s29  ;;  %18 = sbr.rel (!%p16_p9) target bundleno = 7 (0x7), region = 78 }
  0x49   :  { %340 = vsyncpa [#allocation3], 1 }
  0x4a   :  { %342 = vsyncpa [#allocation3 + $0x1], 1 }
  0x4b   :  { %343 = vsyncpa [#allocation6], 1 }
  0x4c   :  { %344 = vsyncpa [#allocation4], 1 }
  0x4d   :  { %346 = vsyncpa [#allocation4 + $0x1], 1 }

</bundles_post_ra>
